<compile_context>
chip_gen: v7x
topology: tpu7x:2x2x1
jax: 0.10.0
libtpu: 0.0.40
codegen_flags: <defaults>
</compile_context>

<pallas_src>
import jax
import jax.numpy as jnp
from jax.experimental import pallas as pl
from jax.experimental.pallas import tpu as pltpu


def _round_up(x, m):
    return ((x + m - 1) // m) * m


def _device_kind():
    try:
        return jax.devices()[0].device_kind.lower()
    except Exception:
        return ""


def _select_tiles(T, H):
    """Lane/sublane-aligned tiles with an H-aware, generation-aware VMEM budget."""
    kind = _device_kind()
    big_vmem = ("v5" in kind) or ("v6" in kind)   # 128 MiB physical VMEM
    is_v7 = "v7" in kind                          # 2 TCs / 64 MiB VMEM

    TN = 256 if H % 256 == 0 else 128
    TK = 512 if H % 512 == 0 else (256 if H % 256 == 0 else 128)

    budget = (96 if big_vmem else 36) * 1024 * 1024

    def usage(tm):
        carry = 2 * tm * H * 2        # (2, TM, H) bf16 ping-pong carry scratch
        acc = tm * TN * 4             # f32 accumulator
        x0 = 2 * tm * H * 2           # double-buffered bf16 x0 tile
        w = 2 * TK * TN * 2           # double-buffered bf16 weight tile
        b = 2 * TN * 4                # double-buffered f32 bias tile
        c = 2 * tm * TN * 2           # double-buffered bf16 control tile
        o = 2 * tm * TN * 2           # double-buffered bf16 output tile
        return carry + acc + x0 + w + b + c + o

    TM = 8
    for cand in (512, 256, 128, 64, 32, 16, 8):
        if usage(cand) <= budget:
            TM = cand
            break

    full = _round_up(T, 8)
    if full <= TM:
        TM = full                     # single m-tile: block == padded extent
    if is_v7 and full > 8:
        # Expose >= 2 m-tiles so the "parallel" m axis can shard across both TCs.
        TM = min(TM, _round_up((full + 1) // 2, 8))

    Tp = _round_up(T, TM)
    cap = (100 if big_vmem else 56) * 1024 * 1024
    vmem_limit = int(min(cap, max(4 * usage(TM), 32 * 1024 * 1024)))
    return TM, TN, TK, Tp, vmem_limit


# ----------------------------------------------------------------------------
# Fused layer-stack kernel: for l in 0..L-1:
#   y_l   = tanh(x_l @ W_l + b_l)          (f32 epilogue, bf16 MXU operands)
#   out_l = y_l + strength_l * control_l   (post-hoc injection, gated on s!=0)
#   x_{l+1} = y_l (un-injected, bf16, VMEM-resident ping-pong carry)
# ----------------------------------------------------------------------------
def layer_stack_forward(x0, w_stack, b_stack, c_stack, ctrl_slot, strengths,
                        out_dtype=jnp.bfloat16):
    """x0: (T,H) f32, w_stack: (L,H,H) bf16, b_stack: (L,1,H) f32,
    c_stack: (C,T,H) bf16 compact controls (C >= 1), ctrl_slot: (L,) int32,
    strengths: (L,) f32 (0 for uncontrolled layers).
    Returns (L, T, H) out_dtype per-layer hidden states with injection applied."""
    T, H = x0.shape
    L = w_stack.shape[0]
    C = c_stack.shape[0]
    assert H % 128 == 0, "hidden dim must be lane-aligned (multiple of 128)"

    TM, TN, TK, Tp, vmem_limit = _select_tiles(T, H)
    nm, nn, nk = Tp // TM, H // TN, H // TK

    if Tp != T:
        pad = Tp - T
        x0 = jnp.pad(x0, ((0, pad), (0, 0)))
        c_stack = jnp.pad(c_stack, ((0, 0), (0, pad), (0, 0)))
    x0 = x0.astype(jnp.bfloat16)

    def kernel(slot_ref, strengths_ref, x0_ref, w_ref, b_ref, c_ref, o_ref,
               acc_ref, act_ref):
        del slot_ref  # consumed only by the control BlockSpec index_map
        l = pl.program_id(1)
        n = pl.program_id(2)
        k = pl.program_id(3)
        slot = l % 2                     # layer l's input lives in act_ref[slot]

        # Seed the carry with this m-tile's embedding slab once per m-tile.
        @pl.when((l == 0) & (n == 0) & (k == 0))
        def _seed():
            act_ref[0] = x0_ref[...]

        @pl.when(k == 0)
        def _init():
            acc_ref[...] = jnp.zeros_like(acc_ref)

        # Single bf16 operand load from the indexed carry slot (no selects).
        kk = pl.multiple_of(k * TK, TK)
        x_in = act_ref[slot, :, pl.ds(kk, TK)]
        acc_ref[...] += jnp.dot(x_in, w_ref[...],
                                preferred_element_type=jnp.float32)

        @pl.when(k == nk - 1)
        def _finalize():
            y = jnp.tanh(acc_ref[...] + b_ref[...])     # f32, un-injected
            nn_off = pl.multiple_of(n * TN, TN)

            # Carry the un-injected activation into the other ping-pong slot
            # (skipped for the last layer; static slot index under pl.when).
            @pl.when((slot == 0) & (l + 1 < L))
            def _():
                act_ref[1, :, pl.ds(nn_off, TN)] = y.astype(jnp.bfloat16)

            @pl.when((slot == 1) & (l + 1 < L))
            def _():
                act_ref[0, :, pl.ds(nn_off, TN)] = y.astype(jnp.bfloat16)

            # Fused post-hoc injection, gated so uncontrolled layers pay nothing.
            s = strengths_ref[l]

            @pl.when(s == 0.0)
            def _():
                o_ref[...] = y.astype(o_ref.dtype)

            @pl.when(s != 0.0)
            def _():
                o_ref[...] = (y + s * c_ref[...].astype(jnp.float32)
                              ).astype(o_ref.dtype)

    out_bytes = jnp.dtype(out_dtype).itemsize
    cost = pl.CostEstimate(
        flops=int(2 * L * Tp * H * H),
        transcendentals=int(L * Tp * H),
        bytes_accessed=int(
            Tp * H * 2                      # x0 (bf16, read once per m-tile)
            + nm * L * H * H * 2            # weights re-streamed per m-tile
            + nm * L * H * 4                # biases re-streamed per m-tile
            + C * Tp * H * 2                # compact controls (bf16)
            + L * Tp * H * out_bytes),      # per-layer outputs
    )

    out = pl.pallas_call(
        kernel,
        out_shape=jax.ShapeDtypeStruct((L, Tp, H), out_dtype),
        grid_spec=pltpu.PrefetchScalarGridSpec(
            num_scalar_prefetch=1,          # ctrl_slot -> SMEM, feeds index_maps
            grid=(nm, L, nn, nk),
            in_specs=[
                pl.BlockSpec(memory_space=pltpu.MemorySpace.SMEM),   # strengths
                pl.BlockSpec((TM, H), lambda m, l, n, k, slot: (m, 0)),       # x0
                pl.BlockSpec((None, TK, TN),
                             lambda m, l, n, k, slot: (l, k, n)),             # W_l
                pl.BlockSpec((None, 1, TN),
                             lambda m, l, n, k, slot: (l, 0, n)),             # b_l
                pl.BlockSpec((None, TM, TN),
                             lambda m, l, n, k, slot: (slot[l], m, n)),       # c
            ],
            out_specs=pl.BlockSpec((None, TM, TN),
                                   lambda m, l, n, k, slot: (l, m, n)),
            scratch_shapes=[
                pltpu.VMEM((TM, TN), jnp.float32),     # f32 matmul accumulator
                pltpu.VMEM((2, TM, H), jnp.bfloat16),  # indexed ping-pong carry
            ],
        ),
        compiler_params=pltpu.CompilerParams(
            dimension_semantics=("parallel", "arbitrary", "arbitrary",
                                 "arbitrary"),
            vmem_limit_bytes=vmem_limit,
        ),
        cost_estimate=cost,
    )(ctrl_slot, strengths, x0, w_stack, b_stack, c_stack)

    return out[:, :T, :]


# ----------------------------------------------------------------------------
# Standalone control injection (layer 0 / embedding output only).
# Mem-bound elementwise: large lane-dense row tiles (pad + slice back).
# ----------------------------------------------------------------------------
def _inject_kernel(h_ref, c_ref, s_ref, o_ref):
    o_ref[...] = (h_ref[...].astype(jnp.float32)
                  + s_ref[0] * c_ref[...].astype(jnp.float32)).astype(o_ref.dtype)


def control_inject(hidden, control, control_strength):
    B, S, H = hidden.shape
    T = B * S
    dt = hidden.dtype
    h2 = hidden.reshape(T, H)
    c2 = control.reshape(T, H)

    TMI = 512 if T > 512 else _round_up(T, 8)
    Tp = _round_up(T, TMI)
    if Tp != T:
        h2 = jnp.pad(h2, ((0, Tp - T), (0, 0)))
        c2 = jnp.pad(c2, ((0, Tp - T), (0, 0)))
    strength = jnp.full((1,), control_strength, dtype=jnp.float32)

    out = pl.pallas_call(
        _inject_kernel,
        out_shape=jax.ShapeDtypeStruct((Tp, H), dt),
        grid_spec=pltpu.PrefetchScalarGridSpec(
            num_scalar_prefetch=0,
            grid=(Tp // TMI,),
            in_specs=[
                pl.BlockSpec((TMI, H), lambda i: (i, 0)),
                pl.BlockSpec((TMI, H), lambda i: (i, 0)),
                pl.BlockSpec(memory_space=pltpu.MemorySpace.SMEM),
            ],
            out_specs=pl.BlockSpec((TMI, H), lambda i: (i, 0)),
        ),
        compiler_params=pltpu.CompilerParams(
            dimension_semantics=("parallel",)),
    )(h2, c2, strength)
    return out[:T].reshape(B, S, H)


# ----------------------------------------------------------------------------
# DynamicControlModel (Pallas version)
# ----------------------------------------------------------------------------
class DynamicControlModelPallas:
    def __init__(self, params, layer_ids, out_dtype=jnp.bfloat16):
        self.embed = jnp.asarray(params["embed"], jnp.float32)          # (V,H)
        self.num_layers = len([k for k in params if k.startswith("w_")])
        # bf16 weights feed the MXU; f32 accumulation happens in-kernel.
        self.w_stack = jnp.stack(
            [jnp.asarray(params[f"w_{l}"]).astype(jnp.bfloat16)
             for l in range(self.num_layers)], axis=0)                  # (L,H,H)
        self.b_stack = jnp.stack(
            [jnp.asarray(params[f"b_{l}"], jnp.float32).reshape(1, -1)
             for l in range(self.num_layers)], axis=0)                  # (L,1,H)
        self.layer_ids = layer_ids          # kept for parity; forward() is driven
        self.control_strength = 2.0         # by raw_control keys, as in the spec
        self.raw_control = None
        self.out_dtype = out_dtype

    def set_raw_control(self, control):
        self.raw_control = control

    def _adjust_control_strength(self, style_score):
        self.control_strength = 1.0 + (1.0 - style_score)

    def generate(self, input_ids, max_length=None, temperature=None, **kwargs):
        # TODO(synk): autoregressive generate() of the wrapped PreTrainedModel
        # has no Pallas equivalent for this synthetic stand-in.
        raise NotImplementedError

    def forward(self, input_ids):
        B, S = input_ids.shape
        H = self.embed.shape[1]
        T = B * S
        L = self.num_layers

        # TODO(synk): the real PreTrainedModel forward has no Pallas equivalent;
        # a deterministic synthetic tanh stack (embedding gather = glue) is used.
        h0 = jnp.take(self.embed, input_ids, axis=0)        # (B,S,H) f32

        raw = self.raw_control if self.raw_control is not None else {}

        # Compact control stack: only controlled layers 1..L get a slot;
        # uncontrolled layers map to slot 0 (data ignored: strength gated to 0).
        ctrl_layers = sorted(lid for lid in raw if 1 <= lid <= L)
        slot_of = {lid: i for i, lid in enumerate(ctrl_layers)}
        ctrl_slot = jnp.asarray([slot_of.get(l + 1, 0) for l in range(L)],
                                jnp.int32)
        strengths = jnp.asarray(
            [self.control_strength if (l + 1) in raw else 0.0
             for l in range(L)], jnp.float32)
        if ctrl_layers:
            c_stack = jnp.stack(
                [jnp.asarray(raw[lid]).reshape(T, H) for lid in ctrl_layers],
                axis=0).astype(jnp.bfloat16)                 # (C,T,H)
        else:
            c_stack = jnp.zeros((1, T, H), jnp.bfloat16)

        hs_stack = layer_stack_forward(
            h0.reshape(T, H).astype(jnp.float32),
            self.w_stack, self.b_stack, c_stack, ctrl_slot, strengths,
            out_dtype=self.out_dtype)                        # (L,T,H)

        h0_out = h0
        if 0 in raw:   # embedding-level control uses the standalone kernel
            h0_out = control_inject(h0, jnp.asarray(raw[0]),
                                    self.control_strength)

        return (h0_out,) + tuple(hs_stack[l].reshape(B, S, H)
                                 for l in range(L))


# ----------------------------------------------------------------------------
# Demo / correctness check
# ----------------------------------------------------------------------------
if __name__ == "__main__":
    key = jax.random.PRNGKey(0)
    B, S, H, V, L = 2, 8, 128, 64, 3   # H lane-aligned (multiple of 128)

    keys = jax.random.split(key, 2 * L + 5)
    params = {"embed": jax.random.normal(keys[0], (V, H), jnp.float32) * 0.1}
    for l in range(L):
        params[f"w_{l}"] = (jax.random.normal(keys[1 + 2 * l], (H, H),
                                              jnp.float32) / jnp.sqrt(H))
        params[f"b_{l}"] = jax.random.normal(keys[2 + 2 * l], (1, H),
                                             jnp.float32) * 0.01

    input_ids = jax.random.randint(keys[-4], (B, S), 0, V)
    # Controls on hidden_states[0], [1], [2]; hidden_states[3] stays uncontrolled
    # (exercises the strength==0 / dummy-slot path).
    controls = {lid: jax.random.normal(keys[-3 + lid], (B, S, H),
                                       jnp.float32) * 0.05 for lid in (0, 1, 2)}

    model = DynamicControlModelPallas(params, layer_ids=[0, 1, 2])
    model.set_raw_control(controls)
    model._adjust_control_strength(style_score=0.25)   # strength = 1.75

    out = jax.block_until_ready(model.forward(input_ids))
    s = model.control_strength

    # Reference 1: exact module semantics in f32 (post-hoc injection).
    def ref_f32():
        h = jnp.take(params["embed"], input_ids, axis=0)
        hs = [h]
        for l in range(L):
            hs.append(jnp.tanh(hs[-1] @ params[f"w_{l}"] + params[f"b_{l}"]))
        for lid, c in controls.items():
            hs[lid] = hs[lid] + s * c
        return hs

    # Reference 2: emulates the kernel numerics (bf16 MXU operands / outputs,
    # f32 accumulation / bias / tanh / injection).
    def ref_bf16():
        h = jnp.take(params["embed"], input_ids, axis=0)
        hs = [h + s * controls[0]]
        x = h.reshape(B * S, H).astype(jnp.bfloat16)
        for l in range(L):
            acc = jnp.dot(x, params[f"w_{l}"].astype(jnp.bfloat16),
                          preferred_element_type=jnp.float32)
            y = jnp.tanh(acc + params[f"b_{l}"])
            x = y.astype(jnp.bfloat16)
            lid = l + 1
            o = y
            if lid in controls:
                c16 = controls[lid].reshape(B * S, H).astype(jnp.bfloat16)
                o = y + s * c16.astype(jnp.float32)
            hs.append(o.astype(jnp.bfloat16).reshape(B, S, H))
        return hs

    ref1 = jax.block_until_ready(ref_f32())
    ref2 = jax.block_until_ready(ref_bf16())

    assert len(out) == L + 1
    # Layer 0 (pure f32 path): tight check.
    assert out[0].shape == ref1[0].shape
    assert bool(jnp.allclose(out[0], ref1[0], atol=1e-5, rtol=1e-5))
    # Layers 1..L (bf16 path): tight vs. emulated ref, loose vs. f32 semantics.
    for l in range(1, L + 1):
        a = out[l].astype(jnp.float32)
        assert a.shape == (B, S, H)
        err2 = float(jnp.max(jnp.abs(a - ref2[l].astype(jnp.float32))))
        err1 = float(jnp.max(jnp.abs(a - ref1[l])))
        assert err2 < 1e-2, f"layer {l}: vs bf16-emulated ref, max err {err2}"
        assert err1 < 3e-2, f"layer {l}: vs f32 semantics ref, max err {err1}"

    print("KERNEL_OK")
</pallas_src>

<mosaic_0001>
module attributes {stable_mosaic.version = 11 : i64} {
  func.func @kernel(%arg0: i32, %arg1: i32, %arg2: i32, %arg3: i32, %arg4: memref<3xi32, #tpu.memory_space<smem>>, %arg5: memref<3xf32, #tpu.memory_space<smem>>, %arg6: memref<16x128xbf16, #tpu.memory_space<vmem>>, %arg7: memref<1x128x128xbf16, #tpu.memory_space<vmem>>, %arg8: memref<1x1x128xf32, #tpu.memory_space<vmem>>, %arg9: memref<1x16x128xbf16, #tpu.memory_space<vmem>>, %arg10: memref<1x16x128xbf16, #tpu.memory_space<vmem>>, %arg11: memref<16x128xf32, #tpu.memory_space<vmem>>, %arg12: memref<2x16x128xbf16, #tpu.memory_space<vmem>>) attributes {dimension_semantics = [#tpu.dimension_semantics<parallel>, #tpu.dimension_semantics<arbitrary>, #tpu.dimension_semantics<arbitrary>, #tpu.dimension_semantics<arbitrary>], iteration_bounds = array<i64: 1, 3, 1, 1>, scalar_prefetch = 1 : i64, scratch_operands = 2 : i64, tpu.core_type = #tpu.core_type<tc>, window_params = [{transform_indices = @transform_0, window_bounds = array<i64: 3>}, {transform_indices = @transform_1, window_bounds = array<i64: 16, 128>}, {transform_indices = @transform_2, window_bounds = array<i64: 1, 128, 128>}, {transform_indices = @transform_3, window_bounds = array<i64: 1, 1, 128>}, {transform_indices = @transform_4, window_bounds = array<i64: 1, 16, 128>}, {transform_indices = @transform_5, window_bounds = array<i64: 1, 16, 128>}]} {
    %c2_i32 = arith.constant 2 : i32
    %c0_i32 = arith.constant 0 : i32
    %0 = arith.cmpi eq, %c2_i32, %c0_i32 : i32
    %c1_i32 = arith.constant 1 : i32
    %1 = arith.select %0, %c1_i32, %c2_i32 : i32
    %2 = arith.remsi %arg1, %1 : i32
    %c0_i32_0 = arith.constant 0 : i32
    %3 = arith.cmpi ne, %2, %c0_i32_0 : i32
    %c0_i32_1 = arith.constant 0 : i32
    %4 = arith.cmpi slt, %2, %c0_i32_1 : i32
    %c0_i32_2 = arith.constant 0 : i32
    %5 = arith.cmpi slt, %1, %c0_i32_2 : i32
    %6 = arith.xori %4, %5 : i1
    %7 = arith.andi %6, %3 : i1
    %8 = arith.addi %2, %1 : i32
    %9 = arith.select %7, %8, %2 : i32
    %c0_i32_3 = arith.constant 0 : i32
    %10 = arith.cmpi eq, %arg1, %c0_i32_3 : i32
    %c0_i32_4 = arith.constant 0 : i32
    %11 = arith.cmpi eq, %arg2, %c0_i32_4 : i32
    %12 = arith.andi %10, %11 : i1
    %c0_i32_5 = arith.constant 0 : i32
    %13 = arith.cmpi eq, %arg3, %c0_i32_5 : i32
    %14 = arith.andi %12, %13 : i1
    %15 = arith.extui %14 : i1 to i32
    %c0_i32_6 = arith.constant 0 : i32
    %16 = arith.cmpi ne, %15, %c0_i32_6 : i32
    scf.if %16 {
      %c0_18 = arith.constant 0 : index
      %c0_19 = arith.constant 0 : index
      %35 = vector.load %arg6[%c0_18, %c0_19] : memref<16x128xbf16, #tpu.memory_space<vmem>>, vector<16x128xbf16>
      %c0_20 = arith.constant 0 : index
      %c0_21 = arith.constant 0 : index
      %c0_22 = arith.constant 0 : index
      %36 = vector.load %arg12[%c0_20, %c0_21, %c0_22] : memref<2x16x128xbf16, #tpu.memory_space<vmem>>, vector<1x16x128xbf16>
      %37 = vector.shape_cast %36 : vector<1x16x128xbf16> to vector<16x128xbf16>
      %38 = vector.shape_cast %35 : vector<16x128xbf16> to vector<1x16x128xbf16>
      tpu.vector_store %arg12[%c0_20, %c0_21, %c0_22], %38 {strides = array<i32>} : memref<2x16x128xbf16, #tpu.memory_space<vmem>>, vector<1x16x128xbf16>,
    } else {
    }
    %c0_i32_7 = arith.constant 0 : i32
    %17 = arith.cmpi eq, %arg3, %c0_i32_7 : i32
    %18 = arith.extui %17 : i1 to i32
    %c0_i32_8 = arith.constant 0 : i32
    %19 = arith.cmpi ne, %18, %c0_i32_8 : i32
    scf.if %19 {
      %cst_18 = arith.constant 0.000000e+00 : f32
      %35 = vector.broadcast %cst_18 : f32 to vector<16x128xf32>
      %c0_19 = arith.constant 0 : index
      %c0_20 = arith.constant 0 : index
      %36 = vector.load %arg11[%c0_19, %c0_20] : memref<16x128xf32, #tpu.memory_space<vmem>>, vector<16x128xf32>
      tpu.vector_store %arg11[%c0_19, %c0_20], %35 {strides = array<i32>} : memref<16x128xf32, #tpu.memory_space<vmem>>, vector<16x128xf32>,
    } else {
    }
    %c128_i32 = arith.constant 128 : i32
    %20 = arith.muli %arg3, %c128_i32 : i32
    %21 = tpu.assume_multiple %20, 128 : i32
    %22 = arith.index_cast %9 : i32 to index
    %c0 = arith.constant 0 : index
    %23 = arith.index_cast %21 : i32 to index
    %24 = vector.load %arg12[%22, %c0, %23] : memref<2x16x128xbf16, #tpu.memory_space<vmem>>, vector<1x16x128xbf16>
    %25 = vector.shape_cast %24 : vector<1x16x128xbf16> to vector<16x128xbf16>
    %c0_9 = arith.constant 0 : index
    %c0_10 = arith.constant 0 : index
    %26 = vector.load %arg11[%c0_9, %c0_10] : memref<16x128xf32, #tpu.memory_space<vmem>>, vector<16x128xf32>
    %c0_11 = arith.constant 0 : index
    %c0_12 = arith.constant 0 : index
    %c0_13 = arith.constant 0 : index
    %27 = vector.load %arg7[%c0_11, %c0_12, %c0_13] : memref<1x128x128xbf16, #tpu.memory_space<vmem>>, vector<1x128x128xbf16>
    %28 = vector.shape_cast %27 : vector<1x128x128xbf16> to vector<128x128xbf16>
    %cst = arith.constant dense<0.000000e+00> : vector<16x128xf32>
    %29 = tpu.matmul %25, %28, %cst {dimension_numbers = #tpu.dot_dimension_numbers<[1], [0], [0], [1], [0, 0, 1, 1], [], []>} : vector<16x128xbf16>, vector<128x128xbf16>, vector<16x128xf32> -> vector<16x128xf32>
    %30 = arith.addf %26, %29 : vector<16x128xf32>
    %c0_14 = arith.constant 0 : index
    %c0_15 = arith.constant 0 : index
    %31 = vector.load %arg11[%c0_14, %c0_15] : memref<16x128xf32, #tpu.memory_space<vmem>>, vector<16x128xf32>
    tpu.vector_store %arg11[%c0_14, %c0_15], %30 {strides = array<i32>} : memref<16x128xf32, #tpu.memory_space<vmem>>, vector<16x128xf32>,
    %c0_i32_16 = arith.constant 0 : i32
    %32 = arith.cmpi eq, %arg3, %c0_i32_16 : i32
    %33 = arith.extui %32 : i1 to i32
    %c0_i32_17 = arith.constant 0 : i32
    %34 = arith.cmpi ne, %33, %c0_i32_17 : i32
    scf.if %34 {
      %c0_18 = arith.constant 0 : index
      %c0_19 = arith.constant 0 : index
      %35 = vector.load %arg11[%c0_18, %c0_19] : memref<16x128xf32, #tpu.memory_space<vmem>>, vector<16x128xf32>
      %c0_20 = arith.constant 0 : index
      %c0_21 = arith.constant 0 : index
      %c0_22 = arith.constant 0 : index
      %36 = vector.load %arg8[%c0_20, %c0_21, %c0_22] : memref<1x1x128xf32, #tpu.memory_space<vmem>>, vector<1x1x128xf32>
      %37 = vector.shape_cast %36 : vector<1x1x128xf32> to vector<1x128xf32>
      %38 = vector.broadcast %37 : vector<1x128xf32> to vector<16x128xf32>
      %39 = arith.addf %35, %38 : vector<16x128xf32>
      %40 = math.tanh %39 : vector<16x128xf32>
      %c128_i32_23 = arith.constant 128 : i32
      %41 = arith.muli %arg2, %c128_i32_23 : i32
      %42 = tpu.assume_multiple %41, 128 : i32
      %c0_i32_24 = arith.constant 0 : i32
      %43 = arith.cmpi eq, %9, %c0_i32_24 : i32
      %c1_i32_25 = arith.constant 1 : i32
      %44 = arith.addi %arg1, %c1_i32_25 : i32
      %c3_i32 = arith.constant 3 : i32
      %45 = arith.cmpi slt, %44, %c3_i32 : i32
      %46 = arith.andi %43, %45 : i1
      %47 = arith.extui %46 : i1 to i32
      %c0_i32_26 = arith.constant 0 : i32
      %48 = arith.cmpi ne, %47, %c0_i32_26 : i32
      scf.if %48 {
        %63 = arith.truncf %40 : vector<16x128xf32> to vector<16x128xbf16>
        %c1 = arith.constant 1 : index
        %c0_35 = arith.constant 0 : index
        %64 = arith.index_cast %42 : i32 to index
        %65 = vector.load %arg12[%c1, %c0_35, %64] : memref<2x16x128xbf16, #tpu.memory_space<vmem>>, vector<1x16x128xbf16>
        %66 = vector.shape_cast %65 : vector<1x16x128xbf16> to vector<16x128xbf16>
        %67 = vector.shape_cast %63 : vector<16x128xbf16> to vector<1x16x128xbf16>
        tpu.vector_store %arg12[%c1, %c0_35, %64], %67 {strides = array<i32>} : memref<2x16x128xbf16, #tpu.memory_space<vmem>>, vector<1x16x128xbf16>,
      } else {
      }
      %c1_i32_27 = arith.constant 1 : i32
      %49 = arith.cmpi eq, %9, %c1_i32_27 : i32
      %c1_i32_28 = arith.constant 1 : i32
      %50 = arith.addi %arg1, %c1_i32_28 : i32
      %c3_i32_29 = arith.constant 3 : i32
      %51 = arith.cmpi slt, %50, %c3_i32_29 : i32
      %52 = arith.andi %49, %51 : i1
      %53 = arith.extui %52 : i1 to i32
      %c0_i32_30 = arith.constant 0 : i32
      %54 = arith.cmpi ne, %53, %c0_i32_30 : i32
      scf.if %54 {
        %63 = arith.truncf %40 : vector<16x128xf32> to vector<16x128xbf16>
        %c0_35 = arith.constant 0 : index
        %c0_36 = arith.constant 0 : index
        %64 = arith.index_cast %42 : i32 to index
        %65 = vector.load %arg12[%c0_35, %c0_36, %64] : memref<2x16x128xbf16, #tpu.memory_space<vmem>>, vector<1x16x128xbf16>
        %66 = vector.shape_cast %65 : vector<1x16x128xbf16> to vector<16x128xbf16>
        %67 = vector.shape_cast %63 : vector<16x128xbf16> to vector<1x16x128xbf16>
        tpu.vector_store %arg12[%c0_35, %c0_36, %64], %67 {strides = array<i32>} : memref<2x16x128xbf16, #tpu.memory_space<vmem>>, vector<1x16x128xbf16>,
      } else {
      }
      %55 = arith.index_cast %arg1 : i32 to index
      %56 = memref.load %arg5[%55] : memref<3xf32, #tpu.memory_space<smem>>
      %cst_31 = arith.constant 0.000000e+00 : f32
      %57 = arith.cmpf oeq, %56, %cst_31 : f32
      %58 = arith.extui %57 : i1 to i32
      %c0_i32_32 = arith.constant 0 : i32
      %59 = arith.cmpi ne, %58, %c0_i32_32 : i32
      scf.if %59 {
        %63 = arith.truncf %40 : vector<16x128xf32> to vector<16x128xbf16>
        %c0_35 = arith.constant 0 : index
        %c0_36 = arith.constant 0 : index
        %c0_37 = arith.constant 0 : index
        %64 = vector.load %arg10[%c0_35, %c0_36, %c0_37] : memref<1x16x128xbf16, #tpu.memory_space<vmem>>, vector<1x16x128xbf16>
        %65 = vector.shape_cast %64 : vector<1x16x128xbf16> to vector<16x128xbf16>
        %66 = vector.shape_cast %63 : vector<16x128xbf16> to vector<1x16x128xbf16>
        tpu.vector_store %arg10[%c0_35, %c0_36, %c0_37], %66 {strides = array<i32>} : memref<1x16x128xbf16, #tpu.memory_space<vmem>>, vector<1x16x128xbf16>,
      } else {
      }
      %cst_33 = arith.constant 0.000000e+00 : f32
      %60 = arith.cmpf one, %56, %cst_33 : f32
      %61 = arith.extui %60 : i1 to i32
      %c0_i32_34 = arith.constant 0 : i32
      %62 = arith.cmpi ne, %61, %c0_i32_34 : i32
      scf.if %62 {
        %c0_35 = arith.constant 0 : index
        %c0_36 = arith.constant 0 : index
        %c0_37 = arith.constant 0 : index
        %63 = vector.load %arg9[%c0_35, %c0_36, %c0_37] : memref<1x16x128xbf16, #tpu.memory_space<vmem>>, vector<1x16x128xbf16>
        %64 = vector.shape_cast %63 : vector<1x16x128xbf16> to vector<16x128xbf16>
        %65 = arith.extf %64 : vector<16x128xbf16> to vector<16x128xf32>
        %66 = vector.broadcast %56 : f32 to vector<16x128xf32>
        %67 = arith.mulf %66, %65 : vector<16x128xf32>
        %68 = arith.addf %40, %67 : vector<16x128xf32>
        %69 = arith.truncf %68 : vector<16x128xf32> to vector<16x128xbf16>
        %c0_38 = arith.constant 0 : index
        %c0_39 = arith.constant 0 : index
        %c0_40 = arith.constant 0 : index
        %70 = vector.load %arg10[%c0_38, %c0_39, %c0_40] : memref<1x16x128xbf16, #tpu.memory_space<vmem>>, vector<1x16x128xbf16>
        %71 = vector.shape_cast %70 : vector<1x16x128xbf16> to vector<16x128xbf16>
        %72 = vector.shape_cast %69 : vector<16x128xbf16> to vector<1x16x128xbf16>
        tpu.vector_store %arg10[%c0_38, %c0_39, %c0_40], %72 {strides = array<i32>} : memref<1x16x128xbf16, #tpu.memory_space<vmem>>, vector<1x16x128xbf16>,
      } else {
      }
    } else {
    }
    return
  }
  func.func @transform_0(%arg0: i32, %arg1: i32, %arg2: i32, %arg3: i32, %arg4: memref<3xi32, #tpu.memory_space<smem>>) -> i32 {
    %c0_i32 = arith.constant 0 : i32
    %c0_i32_0 = arith.constant 0 : i32
    return %c0_i32 : i32
  }
  func.func @transform_1(%arg0: i32, %arg1: i32, %arg2: i32, %arg3: i32, %arg4: memref<3xi32, #tpu.memory_space<smem>>) -> (i32, i32) {
    %c0_i32 = arith.constant 0 : i32
    %c0_i32_0 = arith.constant 0 : i32
    return %arg0, %c0_i32 : i32, i32
  }
  func.func @transform_2(%arg0: i32, %arg1: i32, %arg2: i32, %arg3: i32, %arg4: memref<3xi32, #tpu.memory_space<smem>>) -> (i32, i32, i32) {
    %c0_i32 = arith.constant 0 : i32
    return %arg1, %arg3, %arg2 : i32, i32, i32
  }
  func.func @transform_3(%arg0: i32, %arg1: i32, %arg2: i32, %arg3: i32, %arg4: memref<3xi32, #tpu.memory_space<smem>>) -> (i32, i32, i32) {
    %c0_i32 = arith.constant 0 : i32
    %c0_i32_0 = arith.constant 0 : i32
    return %arg1, %c0_i32, %arg2 : i32, i32, i32
  }
  func.func @transform_4(%arg0: i32, %arg1: i32, %arg2: i32, %arg3: i32, %arg4: memref<3xi32, #tpu.memory_space<smem>>) -> (i32, i32, i32) {
    %0 = arith.index_cast %arg1 : i32 to index
    %1 = memref.load %arg4[%0] : memref<3xi32, #tpu.memory_space<smem>>
    %c0_i32 = arith.constant 0 : i32
    return %1, %arg0, %arg2 : i32, i32, i32
  }
  func.func @transform_5(%arg0: i32, %arg1: i32, %arg2: i32, %arg3: i32, %arg4: memref<3xi32, #tpu.memory_space<smem>>) -> (i32, i32, i32) {
    %c0_i32 = arith.constant 0 : i32
    return %arg1, %arg0, %arg2 : i32, i32, i32
  }
}

</mosaic_0001>

<bundles_post_ra>
// kernel: tpu_custom_call.1
= control target key start
LH: loop header
LB: loop body
LE: loop exit
PB: predicated region body
PF: predicated region fallthrough
CT: control target
= control target key end

     0   :  { %s1633_s0 = inlined_call_operand.hbm [shape: s32[3], index: 0, kind: input, shape index: {}]   ;;  %s1634_s1 = inlined_call_operand.vmem [shape: f32[3], index: 1, kind: input, shape index: {}]   ;;  %s1635_s2 = inlined_call_operand.hbm [shape: bf16[16,128], index: 2, kind: input, shape index: {}]   ;;  %s1636_s3 = inlined_call_operand.hbm [shape: bf16[3,128,128], index: 3, kind: input, shape index: {}]   ;;  %s1637_s4 = inlined_call_operand.hbm [shape: f32[3,1,128], index: 4, kind: input, shape index: {}]   ;;  %s1638_s5 = inlined_call_operand.vmem [shape: bf16[2,16,128], index: 5, kind: input, shape index: {}]   ;;  %s1639_s6 = inlined_call_operand.hbm [shape: bf16[3,16,128], index: 6, kind: output, shape index: {}]  }
   0x1   :  { %1647 = sst [smem:[#allocation21_spill]] %s1634_s1  ;;  %s1035_s23 = scalar_lea.hbm %s1633_s0, 16 }
   0x2   :  { %1648 = sst [smem:[#allocation22_spill]] %s1636_s3  ;;  %p1036_p0 = scmp.ne.s32.totalorder %s1633_s0, %s1035_s23 }
   0x3   :  { %p1039_p1 = scmp.lt.u32.totalorder %s1035_s23, %s1633_s0 }
   0x5   :  { %p1041_p2 = pnand %p1039_p1, %p1036_p0 }
   0x7   :  { %1044 = shalt.err (!%p1041_p2)  }
   0x8   :  { %s1242_s28 = smov [#allocation5]  }
   0x9   :  { %12 = dma.hbm_to_smem %s1633_s0, 16, %s1242_s28, [#allocation4] }
   0xa   :  { %1200 = dma.done.wait [#allocation4], 16 }
   0xb   :  { %1201 = vsyncadd [#allocation4], 4294967280 }
   0xc   :  { %14 = sfence }
   0xd   :  { %15 = vsyncpa [#allocation9], 0 }
   0xe   :  { %16 = vsyncpa [#allocation7], 0 }
   0xf   :  { %17 = vsyncpa [#allocation12], 0 }
  0x10   :  { %19 = vsyncpa [#allocation12 + $0x1], 0 }
  0x11   :  { %20 = vsyncpa [#allocation8], 0 }
  0x12   :  { %22 = vsyncpa [#allocation8 + $0x1], 0  ;;  %s1301_s7 = smov 0   ;;  %s1303_s8 = smov 0  }
  0x13   :  { %s1305_s9 = smov 0   ;;  %s1307_s10 = smov 0  }
  0x14   :  { %s1309_s11 = smov 0   ;;  %s1311_s0 = smov 0  }
  0x15 LB: > { %s50_s12 = sadd.s32 1, %s1236_s11  ;;  %s112_s13 = sadd.s32 1, %s1228_s9  ;;  %s1240_s0 = sphi %s1311_s0, %s28_s0   ;;  %s1236_s11 = sphi %s1309_s11, %s1676_s11   ;;  %s1232_s10 = sphi %s1307_s10, %s1675_s10   ;;  %s1228_s9 = sphi %s1305_s9, %s1674_s9   ;;  %s1224_s8 = sphi %s1303_s8, %s1673_s8   ;;  %s1220_s7 = sphi %s1301_s7, %s1672_s7  }
  0x16   : > { %p52_p3 = scmp.ge.s32.totalorder %s50_s12, 3  ;;  %p119_p4 = scmp.ne.s32.totalorder %s1228_s9, %s1224_s8 }
  0x17   : > { %p120_p5 = scmp.eq.s32.totalorder %s1240_s0, 0  ;;  %p961_p8 = scmp.lt.s32.totalorder %s1240_s0, 3 }
  0x18   : > { %s1678_s12 = smov (%p52_p3, %s50_s12), 0  ;;  %s266_s16 = sand.u32 1, %s1240_s0  }
  0x19   : > { %1649 = sst [smem:[#allocation20_spill]] %s1678_s12  ;;  %p1341_p6 = por %p120_p5, %p119_p4 }
  0x1a   : > { %s105_s15 = ssub.s32 %s1236_s11, %s1678_s12  ;;  %s268_s17 = sand.u32 1, %s1228_s9  }
  0x1b   : > { %p110_p7 = scmp.eq.s32.totalorder %s105_s15, 0  ;;  %s838_s19 = sshll.u32 %s268_s17, 6 }
  0x1c   : > { %s875_s20 = sshll.u32 %s1236_s11, 10  ;;  %s1651_s3 = sld [smem:[#allocation22_spill]] }
  0x1d   : > { %s1351_s18 = scalar_select %p110_p7, %s1228_s9, %s112_s13  }
  0x1e   : > { %s270_s24 = scalar_lea.vmem [#allocation11], %s838_s19  ;;  %p1365_p9 = pnand %p961_p8, %p1341_p6 }
  0x1f   : > { %s280_s25 = sshll.u32 %s270_s24, 4  ;;  %s1369_s27 = scalar_lea.sflag [#allocation12], %s266_s16  ;;  %s1361_s25 = int_to_ptr.vmem [resolvable:$true] %s280_s25 }
  0x20   : > { %p1643_p11 = pneg %p1365_p9 }
  0x22   : > { %s1359_s23 = scalar_lea.hbm %s1651_s3, %s875_s20  ;;  %s1050_s13 = scalar_lea.hbm %s1651_s3, 3072 }
  0x23   : > { %s1045_s28 = scalar_lea.hbm %s1359_s23, 1024  ;;  %p1051_p0 = scmp.lt.u32.totalorder %s1359_s23, %s1651_s3 }
  0x24   : > { %p1046_p10 = scmp.ne.s32.totalorder %s1359_s23, %s1045_s28  ;;  %p1052_p1 = scmp.lt.u32.totalorder %s1050_s13, %s1045_s28 }
  0x25   : > { %p1054_p3 = scmp.lt.u32.totalorder %s1045_s28, %s1359_s23 }
  0x26   : > { %p1048_p12 = pnand %p1643_p11, %p1046_p10  ;;  %p1053_p2 = por %p1052_p1, %p1051_p0 }
  0x28   : > { %p1049_p13 = pneg %p1048_p12  ;;  %p1055_p5 = por %p1054_p3, %p1053_p2 }
  0x2a   : > { %p1056_p6 = pnand %p1055_p5, %p1049_p13 }
  0x2c   : > { %1059 = shalt.err (!%p1056_p6)
}
  0x2d   : > { %s1060_s16 = scalar_lea.vmem %s1361_s25, 1024  ;;  %s1243_s19 = smov [#allocation11]  }
  0x2e   : > { %p1061_p7 = scmp.ne.s32.totalorder %s1361_s25, %s1060_s16  ;;  %s1065_s20 = sshll.u32 %s1243_s19, 4  ;;  %s1066_s20 = int_to_ptr.vmem [resolvable:$false] %s1065_s20 }
  0x2f   : > { %s1067_s21 = scalar_lea.vmem %s1066_s20, 2048  ;;  %p1068_p12 = scmp.lt.s32.totalorder %s1361_s25, %s1066_s20 }
  0x30   : > { %p1063_p8 = pnand %p1061_p7, %p1643_p11  ;;  %p1069_p0 = scmp.lt.s32.totalorder %s1067_s21, %s1060_s16 }
  0x32   : > { %p1064_p10 = pneg %p1063_p8  ;;  %p1070_p1 = por %p1069_p0, %p1068_p12 }
  0x34   : > { %p1071_p2 = pnand %p1070_p1, %p1064_p10 }
  0x36   : > { %1074 = shalt.err (!%p1071_p2)
}
  0x37   : > { %s1640_s22 = smov 64   ;;  %s1641_s24 = smov 4  }
  0x38   : > { %951 = dma.hbm_to_vmem [thread:$0]  (!%p1365_p9), %s1359_s23, 1024, %s1361_s25, %s1369_s27, %s1640_s22, %s1640_s22, %s1641_s24  }
  0x39   : > { %s1401_s28 = sadd.s32 4294967295, %s1240_s0   ;;  %s833_s29 = sadd.s32 4294967294, %s1240_s0  }
  0x3a   : > { %p125_p13 = scmp.ne.s32.totalorder %s1224_s8, %s1220_s7  ;;  %p1642_p3 = scmp.eq.s32.totalorder %s1401_s28, 0 }
  0x3b   : > { %p213_p5 = scmp.eq.s32.totalorder %s1401_s28, 2  ;;  %p219_p6 = scmp.eq.s32.totalorder %s833_s29, 2 }
  0x3c   : > { %p834_p7 = scmp.ge.s32.totalorder %s1240_s0, 1  ;;  %p1411_p8 = por %p1642_p3, %p125_p13 }
  0x3d   : > { %p1418_p10 = por %p213_p5, %p119_p4  ;;  %p1422_p12 = por %p219_p6, %p125_p13 }
  0x3e   : > { %s1653_s30 = scalar_select %p1411_p8, 1, 0 }
  0x3f   : > { %s1654_s23 = scalar_select %p1418_p10, 1, 0 }
  0x40   : > { %s1655_s25 = scalar_select %p1422_p12, 1, 0 }
  0x41   : > { %p226_p0 = scmp.lt.s32.totalorder %s1240_s0, 4  ;;  %s1656_s1 = sld [smem:[#allocation21_spill]] }
  0x42   : > { %s1246_s19 = smov [#allocation10]   ;;  %s841_s29 = sshll.u32 %s1236_s11, 4 }
  0x43   : > { %p1430_p1 = pnand %p834_p7, %p226_p0  ;;  %s252_s20 = sshll.u32 %s1246_s19, 4  ;;  %s1436_s20 = int_to_ptr.vmem [resolvable:$true] %s252_s20 }
  0x44   : > { %s1448_s22 = scalar_lea.hbm %s1637_s4, %s841_s29  ;;  %s293_s24 = scalar_lea.vmem [#allocation13], %s268_s17 }
  0x45   : > { %p941_p4 = pneg %p1430_p1 }
  0x47   : > { %s239_s15 = sshll.u32 %s1656_s1, 4  ;;  %p1440_p2 = pnand %p941_p4, %p1642_p3  ;;  %s240_s15 = int_to_ptr.vmem [resolvable:$true] %s239_s15 }
  0x48   : > { %s301_s1 = sshll.u32 %s293_s24, 4  ;;  %s1075_s19 = scalar_lea.vmem %s240_s15, 16  ;;  %s1452_s1 = int_to_ptr.vmem [resolvable:$true] %s301_s1 }
  0x49   : > { %p1076_p13 = scmp.ne.s32.totalorder %s240_s15, %s1075_s19  ;;  %p1077_p5 = pneg %p1440_p2 }
  0x4a   : > { %p1083_p0 = scmp.lt.s32.totalorder %s240_s15, %s240_s15  ;;  %p1084_p4 = scmp.lt.s32.totalorder %s1075_s19, %s1075_s19 }
  0x4b   : > { %p1078_p6 = pnand %p1077_p5, %p1076_p13 }
  0x4c   : > { %p1085_p3 = por %p1084_p4, %p1083_p0 }
  0x4d   : > { %p1079_p7 = pneg %p1078_p6 }
  0x4f   : > { %p1086_p11 = pnand %p1085_p3, %p1079_p7 }
  0x51   : > { %1089 = shalt.err (!%p1086_p11)
}
  0x52   : > { %s1247_s29 = smov [#allocation6]   ;;  %s1090_s13 = scalar_lea.hbm %s1635_s2, 128 }
  0x53   : > { %944 = dma.vmem_to_smem (!%p1440_p2), %s240_s15, 16, %s1247_s29, [#allocation9]  }
  0x54   : > { %p1091_p12 = scmp.ne.s32.totalorder %s1635_s2, %s1090_s13  ;;  %p1097_p11 = scmp.lt.u32.totalorder %s1090_s13, %s1635_s2 }
  0x56   : > { %p1093_p13 = pnand %p1091_p12, %p1077_p5 }
  0x58   : > { %p1094_p6 = pneg %p1093_p13 }
  0x5a   : > { %p1099_p3 = pnand %p1097_p11, %p1094_p6 }
  0x5c   : > { %1102 = shalt.err (!%p1099_p3)
}
  0x5d   : > { %s1103_s15 = scalar_lea.vmem %s1436_s20, 128  ;;  %p1111_p10 = scmp.lt.s32.totalorder %s1436_s20, %s1436_s20 }
  0x5e   : > { %p1104_p7 = scmp.ne.s32.totalorder %s1436_s20, %s1103_s15  ;;  %p1112_p12 = scmp.lt.s32.totalorder %s1103_s15, %s1103_s15 }
  0x60   : > { %p1106_p0 = pnand %p1104_p7, %p1077_p5  ;;  %p1113_p13 = por %p1112_p12, %p1111_p10 }
  0x62   : > { %p1107_p4 = pneg %p1106_p0 }
  0x64   : > { %p1114_p8 = pnand %p1113_p13, %p1107_p4 }
  0x66   : > { %1117 = shalt.err (!%p1114_p8)
}
  0x67   : > { %s1659_s3 = smov 4   ;;  %s1660_s12 = smov 64  }
  0x68   : > { %947 = dma.hbm_to_vmem [thread:$0]  (!%p1440_p2), %s1635_s2, 128, %s1436_s20, [#allocation7], %s1660_s12, %s1660_s12, %s1659_s3  }
  0x69   : > { %s1118_s24 = scalar_lea.hbm %s1448_s22, 16  ;;  %p1661_p10 = pneg %p1365_p9 }
  0x6a   : > { %p1119_p5 = scmp.ne.s32.totalorder %s1448_s22, %s1118_s24  ;;  %s1123_s14 = scalar_lea.hbm %s1637_s4, 48 }
  0x6b   : > { %p1124_p11 = scmp.lt.u32.totalorder %s1448_s22, %s1637_s4  ;;  %p1125_p3 = scmp.lt.u32.totalorder %s1123_s14, %s1118_s24 }
  0x6c   : > { %p1121_p8 = pnand %p1119_p5, %p1661_p10  ;;  %p1127_p0 = scmp.lt.u32.totalorder %s1118_s24, %s1448_s22 }
  0x6d   : > { %p1126_p7 = por %p1125_p3, %p1124_p11 }
  0x6e   : > { %p1122_p6 = pneg %p1121_p8 }
  0x6f   : > { %p1128_p4 = por %p1127_p0, %p1126_p7 }
  0x71   : > { %p1129_p12 = pnand %p1128_p4, %p1122_p6 }
  0x73   : > { %1132 = shalt.err (!%p1129_p12)
}
  0x74   : > { %s1133_s20 = scalar_lea.vmem %s1452_s1, 16  ;;  %p1662_p13 = pmov %p1661_p10 }
  0x75   : > { %p1134_p2 = scmp.ne.s32.totalorder %s1452_s1, %s1133_s20  ;;  %s1248_s3 = smov [#allocation13]  }
  0x76   : > { %s1138_s12 = sshll.u32 %s1248_s3, 4  ;;  %s1139_s12 = int_to_ptr.vmem [resolvable:$false] %s1138_s12 }
  0x77   : > { %p1136_p5 = pnand %p1134_p2, %p1662_p13  ;;  %s1140_s29 = scalar_lea.vmem %s1139_s12, 32 }
  0x78   : > { %p1141_p8 = scmp.lt.s32.totalorder %s1452_s1, %s1139_s12  ;;  %p1142_p11 = scmp.lt.s32.totalorder %s1140_s29, %s1133_s20 }
  0x79   : > { %p1137_p10 = pneg %p1136_p5 }
  0x7a   : > { %p1143_p3 = por %p1142_p11, %p1141_p8 }
  0x7c   : > { %p1144_p7 = pnand %p1143_p3, %p1137_p10 }
  0x7e   : > { %1147 = shalt.err (!%p1144_p7)
}
  0x7f   : > { %954 = dma.hbm_to_vmem [thread:$0]  (!%p1365_p9), %s1448_s22, 16, %s1452_s1, %s1369_s27  }
  0x80   : > { %328 = sbr.rel (%p1430_p1) target bundleno = 484 (0x1e4), region = 40  ;;  %p1663_p6 = scmp.eq.s32.totalorder (!%p1430_p1), %s1401_s28, 0 }
  0x87   : > { %1203 = dma.done.wait (%p1663_p6), [#allocation9], 16   ;;  %p1664_p0 = pmov %p1663_p6 }
  0x89   : > { %1205 = vsyncadd (%p1664_p0), [#allocation9], 4294967280  ;;  %p1665_p4 = pmov %p1664_p0 }
  0x8a   : > { %p1666_p12 = pmov %p1664_p0 }
  0x8b   : > { %1207 = dma.done.wait (%p1665_p4), [#allocation7], 128  }
  0x8c   : > { %1209 = vsyncadd (%p1666_p12), [#allocation7], 4294967168  ;;  %s338_s26 = sand.u32 1, %s1401_s28   ;;  %s1525_s1 = sand.u32 1, %s1224_s8  }
  0x8d   : > { %s845_s27 = sshll.u32 %s1525_s1, 6  ;;  %s339_s22 = scalar_lea.sflag [#allocation12], %s338_s26 }
  0x8e   : > { %s1528_s16 = scalar_lea.vmem [#allocation11], %s845_s27  ;;  %p1667_p9 = scmp.ne.s32.totalorder %s1653_s30, 0 }
  0x90   : > { %1211 = dma.done.wait (%p1667_p9), %s339_s22, 1040  }
  0x91   : > { %1213 = vsyncadd (%p1667_p9), %s339_s22, 4294966256  ;;  %s350_s17 = scalar_lea.vmem [#allocation13], %s1525_s1 }
  0x92   : > { %355 = sfence }
  0x93   : > { %s846_s28 = sshll.u32 %s1525_s1, 3  ;;  %s397_s24 = sld [smem:[#allocation5 + %s1232_s10]] }
  0x94   : > { %s415_s21 = ssub.s32 0, %s1232_s10  ;;  %p426_p1 = scmp.eq.s32.totalorder %s1232_s10, 0 }
  0x95   : > { %p414_p2 = scmp.lt.s32.totalorder %s1232_s10, 0  ;;  %s849_s13 = smin.u32 %s1232_s10, %s415_s21  ;;  %v1022_v0 = vld [vmem:[#allocation10] sm:$0xff] (%p426_p1)  }
  0x96   : > { %s417_s14 = sand.u32 1, %s849_s13   ;;  %s1548_s29 = scalar_lea.vmem [#allocation14], %s846_s28  ;;  %443 = vst [vmem:[#allocation3] sm:$0xff] (%p426_p1), %v1022_v0 }
  0x97   : > { %s418_s19 = ssub.s32 0, %s417_s14  ;;  %434 = sbr.rel (!%p426_p1) target bundleno = 158 (0x9e), region = 60 }
  0x98   : > { %s1680_s19 = smov (!%p414_p2, %s418_s19), %s417_s14 }
  0x99   : > { %p399_p13 = scmp.lt.s32.totalorder %s397_s24, 1  ;;  %p851_p5 = scmp.lt.s32.totalorder %s1680_s19, 0 }
  0x9a   : > { %s424_s30 = sadd.s32 2, %s1680_s19 }
  0x9b   : > { %s1682_s24 = smov (!%p399_p13, %s397_s24), 1  ;;  %s1684_s30 = smov (!%p851_p5, %s424_s30), %s1680_s19 }
  0x9c   : > { %s876_s15 = sshll.u32 %s1682_s24, 3 }
  0x9d   : > { %s1544_s12 = scalar_lea.vmem %s1638_s5, %s876_s15 }
  0x9e PF: > { %v1023_v1 = vld [vmem:[%s1528_s16] sm:$0xff]   ;;  %v1249_v2 = vmov 0.0   ;;  %v1024_v3 = vld [vmem:[%s1528_s16 + $0x8] sm:$0xff]   ;;  %vm1250_vm0 = vmmov 0   ;;  %v1025_v4 = vld [vmem:[%s1528_s16 + $0x10] sm:$0xff]   ;;  %s855_s26 = sshll.u32 %s1684_s30, 3 }
  0x9f   : > { %907 = vmatprep.subr.bf16.mxu0 %v1249_v2  ;;  %923 = vmatprep.mubr.msk.bf16.mxu0 %vm1250_vm0, %v1249_v2  ;;  %v1026_v5 = vld [vmem:[%s1528_s16 + $0x18] sm:$0xff]   ;;  %v1027_v6 = vld [vmem:[%s1528_s16 + $0x20] sm:$0xff]   ;;  %v1028_v7 = vld [vmem:[%s1528_s16 + $0x28] sm:$0xff]   ;;  %s454_s27 = scalar_lea.vmem [#allocation3], %s855_s26  ;;  %s585_s22 = sadd.s32 1, %s1232_s10 }
  0xa0   : > { %908 = vmatpush3.bf16.msra.mxu0 %v1023_v1  ;;  %v1029_v8 = vld [vmem:[%s1528_s16 + $0x30] sm:$0xff]   ;;  %v1030_v9 = vld [vmem:[%s1528_s16 + $0x38] sm:$0xff]   ;;  %p584_p10 = scmp.eq.s32.totalorder %s1684_s30, 0  ;;  %p1563_p8 = scmp.lt.s32.totalorder %s585_s22, 3 }
  0xa1   : > { %909 = vmatprep.subr.bf16.mxu0 %v1249_v2  ;;  %v455_v10 = vld [vmem:[%s454_s27] sm:$0xff] }
  0xa2   : > { %p587_p11 = pnand %p1563_p8, %p584_p10  ;;  %v864_v11 = vld [vmem:[%s350_s17] ss:$0 sm:$0xff] }
  0xa4   : > { %910 = vmatpush3.bf16.msra.mxu0 %v1024_v3 }
  0xa5   : > { %911 = vmatprep.subr.bf16.mxu0 %v1249_v2 }
  0xa8   : > { %912 = vmatpush3.bf16.msra.mxu0 %v1025_v4 }
  0xa9   : > { %913 = vmatprep.subr.bf16.mxu0 %v1249_v2 }
  0xac   : > { %914 = vmatpush3.bf16.msra.mxu0 %v1026_v5 }
  0xad   : > { %915 = vmatprep.subr.bf16.mxu0 %v1249_v2 }
  0xb0   : > { %916 = vmatpush3.bf16.msra.mxu0 %v1027_v6 }
  0xb1   : > { %917 = vmatprep.subr.bf16.mxu0 %v1249_v2 }
  0xb4   : > { %918 = vmatpush3.bf16.msra.mxu0 %v1028_v7 }
  0xb5   : > { %919 = vmatprep.subr.bf16.mxu0 %v1249_v2 }
  0xb8   : > { %920 = vmatpush3.bf16.msra.mxu0 %v1029_v8 }
  0xb9   : > { %921 = vmatprep.subr.bf16.mxu0 %v1249_v2 }
  0xbc   : > { %922 = vmatpush3.bf16.msra.mxu0 %v1030_v9 }
  0xbf   : > { %924 = vmatmul.mubr.bf16.vlgmr.msra.gmra.mrb[0].mxu0 %v455_v10 }
 0x192   : > { %v556_v12 = vpop.f32.mrb[0].mxu0 }
 0x193   : > { %v579_v13 = vadd.f32 %v864_v11, %v556_v12  ;;  %v925_v14 = vpop.f32.mrb[1].mxu0 }
 0x194   : > { %v559_v15 = vpop.f32.mrb[2].mxu0 }
 0x195   : > { %1031 = vtanh.f32 %v579_v13  ;;  %v580_v16 = vadd.f32 %v864_v11, %v559_v15  ;;  %v926_v17 = vpop.f32.mrb[3].mxu0 }
 0x197   : > { %1033 = vtanh.f32 %v580_v16 }
 0x19b   : > { %590 = sbr.rel (%p587_p11) target bundleno = 421 (0x1a5), region = 72 }
 0x19f   : > { %v1032_v18 = vpop.eup %1031 }
 0x1a1   : > { %v1034_v19 = vpop.eup %1033 }
 0x1a2   : > { %v591_v20 = vpack.c.bf16 %v1034_v19, %v1032_v18 }
 0x1a4   : > { %865 = vst [vmem:[#allocation3 + $0x8] sm:$0xff] %v591_v20 }
 0x1a5 PF: > { %p598_p3 = scmp.eq.s32.totalorder %s1684_s30, 1 }
 0x1a7   : > { %p599_p7 = pnand %p598_p3, %p1563_p8 }
 0x1a8   : > { %v603_v21 = vpack.c.bf16 (!%p599_p7), %v1034_v19, %v1032_v18 }
 0x1a9   : > { %602 = sbr.rel (%p599_p7) target bundleno = 432 (0x1b0), region = 76 }
 0x1aa   : > { %608 = vst [vmem:[#allocation3] sm:$0xff] (!%p599_p7), %v603_v21 }
 0x1b0 PF: > { %s609_s16 = sld [smem:[#allocation6 + %s1232_s10]] }
 0x1b6   : > { %p610_p6 = scmp.eq.f32.partialorder %s609_s16, 0.0 }
 0x1b7   : > { %v887_v22 = vpack.c.bf16 (%p610_p6), %v1034_v19, %v1032_v18 }
 0x1b8   : > { %613 = sbr.rel (!%p610_p6) target bundleno = 447 (0x1bf), region = 80 }
 0x1b9   : > { %888 = vst [vmem:[%s1548_s29] sm:$0xff] (%p610_p6), %v887_v22  }
 0x1bf PF: > { %p624_p0 = scmp.ne.f32.partialorder %s609_s16, 0.0 }
 0x1c0   : > { %v890_v23 = vld [vmem:[%s1544_s12] sm:$0xff] (%p624_p0)   ;;  %v632_v24 = vstv (%p624_p0), %s609_s16 }
 0x1c1   : > { %627 = sbr.rel (!%p624_p0) target bundleno = 458 (0x1ca), region = 84  ;;  %v891_v25 = vunpack.c.l.bf16 (%p624_p0), %v890_v23  ;;  %v892_v26 = vunpack.c.h.bf16 (%p624_p0), %v890_v23 }
 0x1c3   : > { %v633_v27 = vmul.f32 (%p624_p0), %v891_v25, %v632_v24  ;;  %v634_v28 = vmul.f32 (%p624_p0), %v892_v26, %v632_v24 }
 0x1c5   : > { %v635_v29 = vadd.f32 (%p624_p0), %v1032_v18, %v633_v27  ;;  %v636_v30 = vadd.f32 (%p624_p0), %v1034_v19, %v634_v28 }
 0x1c7   : > { %v896_v31 = vpack.c.bf16 (%p624_p0), %v636_v30, %v635_v29 }
 0x1c9   : > { %897 = vst [vmem:[%s1548_s29] sm:$0xff] %v896_v31  }
 0x1ca PF: > { %s883_s17 = sshll.u32 %s1232_s10, 7  ;;  %s664_s14 = sshll.u32 %s1548_s29, 4  ;;  %s1585_s14 = int_to_ptr.vmem [resolvable:$true] %s664_s14 }
 0x1cb   : > { %s1582_s13 = scalar_lea.hbm %s1639_s6, %s883_s17  ;;  %s648_s19 = scalar_lea.sflag [#allocation8], %s1525_s1 }
 0x1cc   : > { %s1148_s30 = scalar_lea.vmem %s1585_s14, 128  ;;  %p1669_p12 = scmp.ne.s32.totalorder %s1654_s23, 0 }
 0x1cd   : > { %p1149_p4 = scmp.ne.s32.totalorder %s1585_s14, %s1148_s30  ;;  %s1251_s15 = smov [#allocation14]  }
 0x1ce   : > { %s1152_s20 = sshll.u32 %s1251_s15, 4  ;;  %s1153_s20 = int_to_ptr.vmem [resolvable:$false] %s1152_s20 }
 0x1cf   : > { %p1150_p9 = pnand %p1149_p4, %p1669_p12  ;;  %s1154_s10 = scalar_lea.vmem %s1153_s20, 256 }
 0x1d0   : > { %p1155_p2 = scmp.lt.s32.totalorder %s1585_s14, %s1153_s20  ;;  %p1156_p13 = scmp.lt.s32.totalorder %s1154_s10, %s1148_s30 }
 0x1d1   : > { %p1151_p1 = pneg %p1150_p9 }
 0x1d2   : > { %p1157_p5 = por %p1156_p13, %p1155_p2 }
 0x1d4   : > { %p1158_p10 = pnand %p1157_p5, %p1151_p1 }
 0x1d6   : > { %1161 = shalt.err (!%p1158_p10)
}
 0x1d7   : > { %s1162_s3 = scalar_lea.hbm %s1582_s13, 128  ;;  %s1166_s26 = scalar_lea.hbm %s1639_s6, 384 }
 0x1d8   : > { %p1163_p8 = scmp.ne.s32.totalorder %s1582_s13, %s1162_s3  ;;  %p1167_p7 = scmp.lt.u32.totalorder %s1582_s13, %s1639_s6 }
 0x1d9   : > { %p1168_p6 = scmp.lt.u32.totalorder %s1166_s26, %s1162_s3  ;;  %p1170_p4 = scmp.lt.u32.totalorder %s1162_s3, %s1582_s13 }
 0x1da   : > { %p1164_p11 = pnand %p1163_p8, %p1669_p12 }
 0x1db   : > { %p1169_p0 = por %p1168_p6, %p1167_p7 }
 0x1dc   : > { %p1165_p3 = pneg %p1164_p11 }
 0x1dd   : > { %p1171_p9 = por %p1170_p4, %p1169_p0 }
 0x1df   : > { %p1172_p1 = pnand %p1171_p9, %p1165_p3 }
 0x1e1   : > { %1175 = shalt.err (!%p1172_p1)
}
 0x1e2   : > { %s1252_s28 = smov 64   ;;  %s1253_s16 = smov 4  }
 0x1e3   : > { %939 = dma.vmem_to_hbm [thread:$0]  (%p1669_p12), %s1585_s14, 128, %s1582_s13, %s648_s19, %s1252_s28, %s1252_s28, %s1253_s16  }
 0x1e4 PF: > { %p964_p2 = scmp.ge.s32.totalorder %s1240_s0, 2  ;;  %s679_s17 = sand.u32 1, %s1220_s7  }
 0x1e5   : > { %p1670_p13 = scmp.ne.s32.totalorder %s1655_s25, 0  ;;  %s680_s24 = scalar_lea.sflag [#allocation8], %s679_s17 }
 0x1e7   : > { %p956_p5 = pnand %p964_p2, %p1670_p13 }
 0x1e9   : > { %1215 = dma.done.wait (!%p956_p5), %s680_s24, 128  }
 0x1ea   : > { %1217 = vsyncadd (!%p956_p5), %s680_s24, 4294967168  ;;  %s28_s0 = sadd.s32 1, %s1240_s0   ;;  %s1671_s23 = sld [smem:[#allocation20_spill]] }
 0x1eb   : > { %p25_p10 = scmp.ge.s32.totalorder %s28_s0, 5   ;;  %s1672_s7 = smov %s1224_s8 }
 0x1ec   : > { %s1673_s8 = smov %s1228_s9  ;;  %s1674_s9 = smov %s1351_s18 }
 0x1ed   : > { %s1675_s10 = smov %s1236_s11  ;;  %27 = sbr.rel (!%p25_p10) target bundleno = 21 (0x15), region = 141 }
 0x1f0   : > { %s1676_s11 = smov %s1671_s23 }
 0x1f4   :  { %685 = vsyncpa [#allocation7], 1 }
 0x1f5   :  { %687 = vsyncpa [#allocation7 + $0x1], 1 }
 0x1f6   :  { %688 = vsyncpa [#allocation12], 1 }
 0x1f7   :  { %690 = vsyncpa [#allocation12 + $0x1], 1 }
 0x1f8   :  { %691 = vsyncpa [#allocation8], 1 }
 0x1f9   :  { %693 = vsyncpa [#allocation8 + $0x1], 1 }
 0x1fa   :  { %694 = vsyncpa [#allocation9], 1 }
 0x1fb   :  { %696 = vsyncpa [#allocation9 + $0x1], 1 }

</bundles_post_ra>
